<compile_context>
chip_gen: v7x
topology: tpu7x:2x2x1
jax: 0.10.0
libtpu: 0.0.40
codegen_flags: <defaults>
</compile_context>

<pallas_src>
import functools

import jax
import jax.numpy as jnp
import numpy as np
from jax.experimental import pallas as pl
from jax.experimental.pallas import tpu as pltpu

LN_EPS = 1e-5          # nn.LayerNorm default
NEG_INF = -1e30        # large-negative finite sentinel (avoids inf arithmetic)
_VMEM_LIMIT = 32 * 1024 * 1024


def _choose_tile_s(C, S, itemsize):
    """128-multiple S tile keeping pass-2's 4 double-buffered (C, tile) streams
    (x in + out, each double buffered) under ~12 MiB of the 32 MiB VMEM limit,
    leaving headroom for f32 temporaries in pass 1."""
    budget = 12 * 1024 * 1024
    max_tile = max(128, (budget // (4 * C * itemsize)) // 128 * 128)
    s_lanes = pl.cdiv(S, 128) * 128
    return int(min(max_tile, s_lanes))


# --------------------------------------------------------------------------
# Pass 1: online-softmax attention pooling + channel_add MLP  ->  term (B,C,1)
# --------------------------------------------------------------------------
def _ctx_term_kernel(x_ref, wm_ref, w1_ref, b1_ref, g_ref, be_ref, w2_ref,
                     b2_ref, term_ref, m_acc, l_acc, c_acc,
                     *, s_true, tile_s, needs_mask):
    """grid = (B, num_s_tiles).

    x_ref   : (1, C, tile_s)  input tile (flattened spatial)
    wm_ref  : (1, C)          conv_mask weight (nn.Linear(C, 1).weight)
    w1_ref  : (P, C)          channel_add_conv[0].weight   (out, in)
    b1_ref  : (P, 1)          channel_add_conv[0].bias
    g_ref   : (P, 1)          LayerNorm gamma
    be_ref  : (P, 1)          LayerNorm beta
    w2_ref  : (C, P)          channel_add_conv[3].weight   (out, in)
    b2_ref  : (C, 1)          channel_add_conv[3].bias
    term_ref: (1, C, 1)       output per-channel additive term (f32)
    m_acc/l_acc: (1, 1) f32   running softmax max / exp-sum
    c_acc   : (C, 1) f32      running sum_s x[:, s] * exp(logit_s - m)
    """
    s = pl.program_id(1)

    @pl.when(s == 0)
    def _():
        m_acc[...] = jnp.full_like(m_acc, NEG_INF)
        l_acc[...] = jnp.zeros_like(l_acc)
        c_acc[...] = jnp.zeros_like(c_acc)

    x = x_ref[0].astype(jnp.float32)                          # (C, tile_s)

    # conv_mask logits.  NOTE: the conv_mask bias is constant over spatial
    # locations and cancels exactly in the softmax, so it is omitted here.
    logits = jnp.dot(wm_ref[...].astype(jnp.float32), x,
                     preferred_element_type=jnp.float32)      # (1, tile_s)
    if needs_mask:
        pos = s * tile_s + jax.lax.broadcasted_iota(jnp.int32, (1, tile_s), 1)
        logits = jnp.where(pos < s_true, logits, NEG_INF)     # mask pad lanes

    # online softmax update
    m_prev = m_acc[...]                                        # (1, 1)
    m_new = jnp.maximum(m_prev, jnp.max(logits, axis=-1, keepdims=True))
    alpha = jnp.exp(m_prev - m_new)                            # rescale factor
    e = jnp.exp(logits - m_new)                                # (1, tile_s)
    l_acc[...] = alpha * l_acc[...] + jnp.sum(e, axis=-1, keepdims=True)
    # context accumulation: VPU multiply + lane reduce (no N=1 MXU matmul)
    c_acc[...] = alpha * c_acc[...] + jnp.sum(x * e, axis=-1, keepdims=True)
    m_acc[...] = m_new

    @pl.when(s == pl.num_programs(1) - 1)
    def _():
        # Runs once per batch element; overlaps with the DMA of the next
        # batch's tiles.  (Exact reciprocal: executed once, cost negligible.)
        ctx = c_acc[...] * pl.reciprocal(l_acc[...], approx=False)   # (C, 1)

        # channel_add_conv: Linear -> LayerNorm -> ReLU -> Linear
        # (weights in (out, in) layout so the feature axis stays on sublanes)
        h = jnp.dot(w1_ref[...].astype(jnp.float32), ctx,
                    preferred_element_type=jnp.float32)
        h = h + b1_ref[...].astype(jnp.float32)                      # (P, 1)
        mu = jnp.mean(h, axis=0, keepdims=True)
        var = jnp.mean((h - mu) ** 2, axis=0, keepdims=True)
        hn = (h - mu) * jax.lax.rsqrt(var + LN_EPS)
        hn = hn * g_ref[...].astype(jnp.float32) + be_ref[...].astype(jnp.float32)
        hr = jnp.maximum(hn, 0.0)
        term = jnp.dot(w2_ref[...].astype(jnp.float32), hr,
                       preferred_element_type=jnp.float32)
        term = term + b2_ref[...].astype(jnp.float32)                # (C, 1)
        term_ref[0] = term.astype(term_ref.dtype)


# --------------------------------------------------------------------------
# Pass 2: broadcast add   out[b, :, s_tile] = x[b, :, s_tile] + term[b, :, 0]
# --------------------------------------------------------------------------
def _broadcast_add_kernel(x_ref, term_ref, o_ref):
    o_ref[0] = (x_ref[0].astype(jnp.float32)
                + term_ref[0].astype(jnp.float32)).astype(o_ref.dtype)


# --------------------------------------------------------------------------
# Wrapper
# --------------------------------------------------------------------------
def context_block_forward(x, params, tile_s=None):
    """x: (B, C, Z, H, W) -> (B, C, Z, H, W).  Params in PyTorch layouts."""
    B, C, Z, H, W = x.shape
    S = Z * H * W
    P = params["w1"].shape[0]
    itemsize = jnp.dtype(x.dtype).itemsize

    if tile_s is None:
        tile_s = _choose_tile_s(C, S, itemsize)
    tile_s = max(128, (int(tile_s) // 128) * 128)              # lane-dense tile
    num_s = pl.cdiv(S, tile_s)
    s_pad = num_s * tile_s
    needs_mask = (s_pad != S)

    x_flat = x.reshape(B, C, S)
    if needs_mask:
        x_flat = jnp.pad(x_flat, ((0, 0), (0, 0), (0, s_pad - S)))

    wm = params["wm"].reshape(1, C)
    w1 = params["w1"].reshape(P, C)
    b1 = params["b1"].reshape(P, 1)
    g = params["g"].reshape(P, 1)
    be = params["be"].reshape(P, 1)
    w2 = params["w2"].reshape(C, P)
    b2 = params["b2"].reshape(C, 1)

    kern = functools.partial(_ctx_term_kernel, s_true=S, tile_s=tile_s,
                             needs_mask=needs_mask)

    # Pass 1: reduction over S tiles -> term (B, C, 1)
    term = pl.pallas_call(
        kern,
        out_shape=jax.ShapeDtypeStruct((B, C, 1), jnp.float32),
        grid=(B, num_s),
        in_specs=[
            pl.BlockSpec((1, C, tile_s), lambda b, s: (b, 0, s)),   # x
            pl.BlockSpec((1, C), lambda b, s: (0, 0)),              # wm
            pl.BlockSpec((P, C), lambda b, s: (0, 0)),              # w1
            pl.BlockSpec((P, 1), lambda b, s: (0, 0)),              # b1
            pl.BlockSpec((P, 1), lambda b, s: (0, 0)),              # gamma
            pl.BlockSpec((P, 1), lambda b, s: (0, 0)),              # beta
            pl.BlockSpec((C, P), lambda b, s: (0, 0)),              # w2
            pl.BlockSpec((C, 1), lambda b, s: (0, 0)),              # b2
        ],
        out_specs=pl.BlockSpec((1, C, 1), lambda b, s: (b, 0, 0)),
        scratch_shapes=[
            pltpu.VMEM((1, 1), jnp.float32),    # running max
            pltpu.VMEM((1, 1), jnp.float32),    # running exp-sum
            pltpu.VMEM((C, 1), jnp.float32),    # running context accumulator
        ],
        compiler_params=pltpu.CompilerParams(
            dimension_semantics=("parallel", "arbitrary"),
            vmem_limit_bytes=_VMEM_LIMIT),
    )(x_flat, wm, w1, b1, g, be, w2, b2)

    # Pass 2: broadcast add over S tiles
    out_flat = pl.pallas_call(
        _broadcast_add_kernel,
        out_shape=jax.ShapeDtypeStruct((B, C, s_pad), x.dtype),
        grid=(B, num_s),
        in_specs=[
            pl.BlockSpec((1, C, tile_s), lambda b, s: (b, 0, s)),   # x
            pl.BlockSpec((1, C, 1), lambda b, s: (b, 0, 0)),        # term
        ],
        out_specs=pl.BlockSpec((1, C, tile_s), lambda b, s: (b, 0, s)),
        compiler_params=pltpu.CompilerParams(
            dimension_semantics=("parallel", "parallel"),
            vmem_limit_bytes=_VMEM_LIMIT),
    )(x_flat, term)

    if needs_mask:
        out_flat = out_flat[:, :, :S]
    return out_flat.reshape(B, C, Z, H, W)


context_block = jax.jit(context_block_forward, static_argnames=("tile_s",))


# --------------------------------------------------------------------------
# Pure-JAX reference (matches the PyTorch module semantics)
# --------------------------------------------------------------------------
def ref_forward(x, params):
    B, C, Z, H, W = x.shape
    S = Z * H * W
    xr = x.reshape(B, C, S).astype(jnp.float32)
    logits = jnp.einsum('bcs,c->bs', xr, params["wm"][0]) + params["bm"]
    p = jax.nn.softmax(logits, axis=-1)
    ctx = jnp.einsum('bcs,bs->bc', xr, p)                        # (B, C)
    h = ctx @ params["w1"].T + params["b1"]
    mu = h.mean(-1, keepdims=True)
    var = ((h - mu) ** 2).mean(-1, keepdims=True)
    hn = (h - mu) / jnp.sqrt(var + LN_EPS) * params["g"] + params["be"]
    hr = jnp.maximum(hn, 0.0)
    term = hr @ params["w2"].T + params["b2"]                    # (B, C)
    out = x.astype(jnp.float32) + term[:, :, None, None, None]
    return out.astype(x.dtype)


def make_params(key, C, P):
    """Parameters in PyTorch-native layouts (nn.Linear weight = (out, in)).

    NOTE: the PyTorch module zero-inits the last Linear (last_zero_init),
    making the block an exact identity at init; small random weights are used
    here so the compute path is actually exercised.
    """
    ks = jax.random.split(key, 5)
    return {
        "wm": jax.random.normal(ks[0], (1, C), jnp.float32) / np.sqrt(C),
        "bm": jnp.zeros((), jnp.float32),   # conv_mask bias (cancels in softmax)
        "w1": jax.random.normal(ks[1], (P, C), jnp.float32) / np.sqrt(C),
        "b1": jax.random.normal(ks[2], (P,), jnp.float32) * 0.1,
        "g":  jnp.ones((P,), jnp.float32),
        "be": jnp.zeros((P,), jnp.float32),
        "w2": jax.random.normal(ks[3], (C, P), jnp.float32) / np.sqrt(P),
        "b2": jax.random.normal(ks[4], (C,), jnp.float32) * 0.1,
    }


if __name__ == "__main__":
    key = jax.random.PRNGKey(0)
    ratio = 0.25
    cases = [
        # (B, C, Z, H, W, tile_s_override)
        (2, 32, 4, 8, 8, None),   # S=256: lane-aligned, single S tile per batch
        (2, 32, 4, 8, 8, 128),    # forces 2 S tiles: exercises online softmax
        (2, 32, 3, 7, 7, None),   # S=147: exercises zero padding + logit mask
    ]
    for (B, C, Z, H, W, ts) in cases:
        P = int(C * ratio)
        key, kx, kp = jax.random.split(key, 3)
        x = jax.random.normal(kx, (B, C, Z, H, W), jnp.float32)
        params = make_params(kp, C, P)

        out = jax.block_until_ready(context_block(x, params, tile_s=ts))
        ref = ref_forward(x, params)
        np.testing.assert_allclose(np.asarray(out), np.asarray(ref),
                                   rtol=1e-4, atol=1e-4)
    print("KERNEL_OK")
</pallas_src>

<mosaic_0001>
module attributes {stable_mosaic.version = 11 : i64} {
  func.func @_broadcast_add_kernel(%arg0: i32, %arg1: i32, %arg2: memref<1x32x256xf32, #tpu.memory_space<vmem>>, %arg3: memref<1x32x1xf32, #tpu.memory_space<vmem>>, %arg4: memref<1x32x256xf32, #tpu.memory_space<vmem>>) attributes {dimension_semantics = [#tpu.dimension_semantics<parallel>, #tpu.dimension_semantics<parallel>], iteration_bounds = array<i64: 2, 1>, scalar_prefetch = 0 : i64, scratch_operands = 0 : i64, tpu.core_type = #tpu.core_type<tc>, window_params = [{transform_indices = @transform_0, window_bounds = array<i64: 1, 32, 256>}, {transform_indices = @transform_1, window_bounds = array<i64: 1, 32, 1>}, {transform_indices = @transform_2, window_bounds = array<i64: 1, 32, 256>}]} {
    %c0 = arith.constant 0 : index
    %c0_0 = arith.constant 0 : index
    %c0_1 = arith.constant 0 : index
    %0 = vector.load %arg2[%c0, %c0_0, %c0_1] : memref<1x32x256xf32, #tpu.memory_space<vmem>>, vector<1x32x256xf32>
    %1 = vector.shape_cast %0 : vector<1x32x256xf32> to vector<32x256xf32>
    %c0_2 = arith.constant 0 : index
    %c0_3 = arith.constant 0 : index
    %c0_4 = arith.constant 0 : index
    %2 = vector.load %arg3[%c0_2, %c0_3, %c0_4] : memref<1x32x1xf32, #tpu.memory_space<vmem>>, vector<1x32x1xf32>
    %3 = vector.shape_cast %2 : vector<1x32x1xf32> to vector<32x1xf32>
    %4 = vector.broadcast %3 : vector<32x1xf32> to vector<32x256xf32>
    %5 = arith.addf %1, %4 : vector<32x256xf32>
    %c0_5 = arith.constant 0 : index
    %c0_6 = arith.constant 0 : index
    %c0_7 = arith.constant 0 : index
    %6 = vector.load %arg4[%c0_5, %c0_6, %c0_7] : memref<1x32x256xf32, #tpu.memory_space<vmem>>, vector<1x32x256xf32>
    %7 = vector.shape_cast %6 : vector<1x32x256xf32> to vector<32x256xf32>
    %8 = vector.shape_cast %5 : vector<32x256xf32> to vector<1x32x256xf32>
    tpu.vector_store %arg4[%c0_5, %c0_6, %c0_7], %8 {strides = array<i32>} : memref<1x32x256xf32, #tpu.memory_space<vmem>>, vector<1x32x256xf32>,
    return
  }
  func.func @transform_0(%arg0: i32, %arg1: i32) -> (i32, i32, i32) {
    %c0_i32 = arith.constant 0 : i32
    %c0_i32_0 = arith.constant 0 : i32
    return %arg0, %c0_i32, %arg1 : i32, i32, i32
  }
  func.func @transform_1(%arg0: i32, %arg1: i32) -> (i32, i32, i32) {
    %c0_i32 = arith.constant 0 : i32
    %c0_i32_0 = arith.constant 0 : i32
    %c0_i32_1 = arith.constant 0 : i32
    return %arg0, %c0_i32, %c0_i32_0 : i32, i32, i32
  }
  func.func @transform_2(%arg0: i32, %arg1: i32) -> (i32, i32, i32) {
    %c0_i32 = arith.constant 0 : i32
    %c0_i32_0 = arith.constant 0 : i32
    return %arg0, %c0_i32, %arg1 : i32, i32, i32
  }
}

module attributes {stable_mosaic.version = 11 : i64} {
  func.func @_ctx_term_kernel(%arg0: i32, %arg1: i32, %arg2: memref<1x32x256xf32, #tpu.memory_space<vmem>>, %arg3: memref<1x32xf32, #tpu.memory_space<vmem>>, %arg4: memref<8x32xf32, #tpu.memory_space<vmem>>, %arg5: memref<8x1xf32, #tpu.memory_space<vmem>>, %arg6: memref<8x1xf32, #tpu.memory_space<vmem>>, %arg7: memref<8x1xf32, #tpu.memory_space<vmem>>, %arg8: memref<32x8xf32, #tpu.memory_space<vmem>>, %arg9: memref<32x1xf32, #tpu.memory_space<vmem>>, %arg10: memref<1x32x1xf32, #tpu.memory_space<vmem>>, %arg11: memref<1x1xf32, #tpu.memory_space<vmem>>, %arg12: memref<1x1xf32, #tpu.memory_space<vmem>>, %arg13: memref<32x1xf32, #tpu.memory_space<vmem>>) attributes {dimension_semantics = [#tpu.dimension_semantics<parallel>, #tpu.dimension_semantics<arbitrary>], iteration_bounds = array<i64: 2, 1>, scalar_prefetch = 0 : i64, scratch_operands = 3 : i64, tpu.core_type = #tpu.core_type<tc>, window_params = [{transform_indices = @transform_0, window_bounds = array<i64: 1, 32, 256>}, {pipeline_mode = #tpu.pipeline_mode<synchronous>, transform_indices = @transform_1, window_bounds = array<i64: 1, 32>}, {pipeline_mode = #tpu.pipeline_mode<synchronous>, transform_indices = @transform_2, window_bounds = array<i64: 8, 32>}, {pipeline_mode = #tpu.pipeline_mode<synchronous>, transform_indices = @transform_3, window_bounds = array<i64: 8, 1>}, {pipeline_mode = #tpu.pipeline_mode<synchronous>, transform_indices = @transform_4, window_bounds = array<i64: 8, 1>}, {pipeline_mode = #tpu.pipeline_mode<synchronous>, transform_indices = @transform_5, window_bounds = array<i64: 8, 1>}, {pipeline_mode = #tpu.pipeline_mode<synchronous>, transform_indices = @transform_6, window_bounds = array<i64: 32, 8>}, {pipeline_mode = #tpu.pipeline_mode<synchronous>, transform_indices = @transform_7, window_bounds = array<i64: 32, 1>}, {transform_indices = @transform_8, window_bounds = array<i64: 1, 32, 1>}]} {
    %c0_i32 = arith.constant 0 : i32
    %0 = arith.cmpi eq, %arg1, %c0_i32 : i32
    %1 = arith.extui %0 : i1 to i32
    %c0_i32_0 = arith.constant 0 : i32
    %2 = arith.cmpi ne, %1, %c0_i32_0 : i32
    scf.if %2 {
      %cst_22 = arith.constant -1.000000e+30 : f32
      %35 = vector.broadcast %cst_22 : f32 to vector<1x1xf32>
      %c0_23 = arith.constant 0 : index
      %c0_24 = arith.constant 0 : index
      %36 = vector.load %arg11[%c0_23, %c0_24] : memref<1x1xf32, #tpu.memory_space<vmem>>, vector<1x1xf32>
      tpu.vector_store %arg11[%c0_23, %c0_24], %35 {strides = array<i32>} : memref<1x1xf32, #tpu.memory_space<vmem>>, vector<1x1xf32>,
      %cst_25 = arith.constant 0.000000e+00 : f32
      %37 = vector.broadcast %cst_25 : f32 to vector<1x1xf32>
      %c0_26 = arith.constant 0 : index
      %c0_27 = arith.constant 0 : index
      %38 = vector.load %arg12[%c0_26, %c0_27] : memref<1x1xf32, #tpu.memory_space<vmem>>, vector<1x1xf32>
      tpu.vector_store %arg12[%c0_26, %c0_27], %37 {strides = array<i32>} : memref<1x1xf32, #tpu.memory_space<vmem>>, vector<1x1xf32>,
      %cst_28 = arith.constant 0.000000e+00 : f32
      %39 = vector.broadcast %cst_28 : f32 to vector<32x1xf32>
      %c0_29 = arith.constant 0 : index
      %c0_30 = arith.constant 0 : index
      %40 = vector.load %arg13[%c0_29, %c0_30] : memref<32x1xf32, #tpu.memory_space<vmem>>, vector<32x1xf32>
      tpu.vector_store %arg13[%c0_29, %c0_30], %39 {strides = array<i32>} : memref<32x1xf32, #tpu.memory_space<vmem>>, vector<32x1xf32>,
    } else {
    }
    %c0 = arith.constant 0 : index
    %c0_1 = arith.constant 0 : index
    %c0_2 = arith.constant 0 : index
    %3 = vector.load %arg2[%c0, %c0_1, %c0_2] : memref<1x32x256xf32, #tpu.memory_space<vmem>>, vector<1x32x256xf32>
    %4 = vector.shape_cast %3 : vector<1x32x256xf32> to vector<32x256xf32>
    %c0_3 = arith.constant 0 : index
    %c0_4 = arith.constant 0 : index
    %5 = vector.load %arg3[%c0_3, %c0_4] : memref<1x32xf32, #tpu.memory_space<vmem>>, vector<1x32xf32>
    %cst = arith.constant dense<0.000000e+00> : vector<1x256xf32>
    %6 = tpu.matmul %5, %4, %cst {dimension_numbers = #tpu.dot_dimension_numbers<[1], [0], [0], [1], [0, 0, 1, 1], [], []>} : vector<1x32xf32>, vector<32x256xf32>, vector<1x256xf32> -> vector<1x256xf32>
    %c0_5 = arith.constant 0 : index
    %c0_6 = arith.constant 0 : index
    %7 = vector.load %arg11[%c0_5, %c0_6] : memref<1x1xf32, #tpu.memory_space<vmem>>, vector<1x1xf32>
    %cst_7 = arith.constant dense<0xFF800000> : vector<1xf32>
    %8 = vector.multi_reduction <maximumf>, %6, %cst_7 [1] : vector<1x256xf32> to vector<1xf32>
    %9 = vector.shape_cast %8 : vector<1xf32> to vector<1x1xf32>
    %10 = arith.maximumf %7, %9 : vector<1x1xf32>
    %11 = arith.subf %7, %10 : vector<1x1xf32>
    %12 = math.exp %11 : vector<1x1xf32>
    %13 = vector.broadcast %10 : vector<1x1xf32> to vector<1x256xf32>
    %14 = arith.subf %6, %13 : vector<1x256xf32>
    %15 = math.exp %14 : vector<1x256xf32>
    %c0_8 = arith.constant 0 : index
    %c0_9 = arith.constant 0 : index
    %16 = vector.load %arg12[%c0_8, %c0_9] : memref<1x1xf32, #tpu.memory_space<vmem>>, vector<1x1xf32>
    %17 = arith.mulf %12, %16 : vector<1x1xf32>
    %cst_10 = arith.constant dense<0.000000e+00> : vector<1xf32>
    %18 = vector.multi_reduction <add>, %15, %cst_10 [1] : vector<1x256xf32> to vector<1xf32>
    %19 = vector.shape_cast %18 : vector<1xf32> to vector<1x1xf32>
    %20 = arith.addf %17, %19 : vector<1x1xf32>
    %c0_11 = arith.constant 0 : index
    %c0_12 = arith.constant 0 : index
    %21 = vector.load %arg12[%c0_11, %c0_12] : memref<1x1xf32, #tpu.memory_space<vmem>>, vector<1x1xf32>
    tpu.vector_store %arg12[%c0_11, %c0_12], %20 {strides = array<i32>} : memref<1x1xf32, #tpu.memory_space<vmem>>, vector<1x1xf32>,
    %c0_13 = arith.constant 0 : index
    %c0_14 = arith.constant 0 : index
    %22 = vector.load %arg13[%c0_13, %c0_14] : memref<32x1xf32, #tpu.memory_space<vmem>>, vector<32x1xf32>
    %23 = vector.broadcast %12 : vector<1x1xf32> to vector<32x1xf32>
    %24 = arith.mulf %23, %22 : vector<32x1xf32>
    %25 = vector.broadcast %15 : vector<1x256xf32> to vector<32x256xf32>
    %26 = arith.mulf %4, %25 : vector<32x256xf32>
    %cst_15 = arith.constant dense<0.000000e+00> : vector<32xf32>
    %27 = vector.multi_reduction <add>, %26, %cst_15 [1] : vector<32x256xf32> to vector<32xf32>
    %28 = vector.shape_cast %27 : vector<32xf32> to vector<32x1xf32>
    %29 = arith.addf %24, %28 : vector<32x1xf32>
    %c0_16 = arith.constant 0 : index
    %c0_17 = arith.constant 0 : index
    %30 = vector.load %arg13[%c0_16, %c0_17] : memref<32x1xf32, #tpu.memory_space<vmem>>, vector<32x1xf32>
    tpu.vector_store %arg13[%c0_16, %c0_17], %29 {strides = array<i32>} : memref<32x1xf32, #tpu.memory_space<vmem>>, vector<32x1xf32>,
    %c0_18 = arith.constant 0 : index
    %c0_19 = arith.constant 0 : index
    %31 = vector.load %arg11[%c0_18, %c0_19] : memref<1x1xf32, #tpu.memory_space<vmem>>, vector<1x1xf32>
    tpu.vector_store %arg11[%c0_18, %c0_19], %10 {strides = array<i32>} : memref<1x1xf32, #tpu.memory_space<vmem>>, vector<1x1xf32>,
    %c0_i32_20 = arith.constant 0 : i32
    %32 = arith.cmpi eq, %arg1, %c0_i32_20 : i32
    %33 = arith.extui %32 : i1 to i32
    %c0_i32_21 = arith.constant 0 : i32
    %34 = arith.cmpi ne, %33, %c0_i32_21 : i32
    scf.if %34 {
      %c0_22 = arith.constant 0 : index
      %c0_23 = arith.constant 0 : index
      %35 = vector.load %arg13[%c0_22, %c0_23] : memref<32x1xf32, #tpu.memory_space<vmem>>, vector<32x1xf32>
      %c0_24 = arith.constant 0 : index
      %c0_25 = arith.constant 0 : index
      %36 = vector.load %arg12[%c0_24, %c0_25] : memref<1x1xf32, #tpu.memory_space<vmem>>, vector<1x1xf32>
      %37 = tpu.reciprocal %36 : vector<1x1xf32> -> vector<1x1xf32>
      %38 = vector.broadcast %37 : vector<1x1xf32> to vector<32x1xf32>
      %39 = arith.mulf %35, %38 : vector<32x1xf32>
      %c0_26 = arith.constant 0 : index
      %c0_27 = arith.constant 0 : index
      %40 = vector.load %arg4[%c0_26, %c0_27] : memref<8x32xf32, #tpu.memory_space<vmem>>, vector<8x32xf32>
      %cst_28 = arith.constant dense<0.000000e+00> : vector<8x1xf32>
      %41 = tpu.matmul %40, %39, %cst_28 {dimension_numbers = #tpu.dot_dimension_numbers<[1], [0], [0], [1], [0, 0, 1, 1], [], []>} : vector<8x32xf32>, vector<32x1xf32>, vector<8x1xf32> -> vector<8x1xf32>
      %c0_29 = arith.constant 0 : index
      %c0_30 = arith.constant 0 : index
      %42 = vector.load %arg5[%c0_29, %c0_30] : memref<8x1xf32, #tpu.memory_space<vmem>>, vector<8x1xf32>
      %43 = arith.addf %41, %42 : vector<8x1xf32>
      %cst_31 = arith.constant dense<0.000000e+00> : vector<1xf32>
      %44 = vector.multi_reduction <add>, %43, %cst_31 [0] : vector<8x1xf32> to vector<1xf32>
      %45 = vector.shape_cast %44 : vector<1xf32> to vector<1x1xf32>
      %cst_32 = arith.constant 8.000000e+00 : f32
      %46 = vector.broadcast %cst_32 : f32 to vector<1x1xf32>
      %47 = arith.divf %45, %46 : vector<1x1xf32>
      %48 = vector.broadcast %47 : vector<1x1xf32> to vector<8x1xf32>
      %49 = arith.subf %43, %48 : vector<8x1xf32>
      %50 = arith.mulf %49, %49 : vector<8x1xf32>
      %cst_33 = arith.constant dense<0.000000e+00> : vector<1xf32>
      %51 = vector.multi_reduction <add>, %50, %cst_33 [0] : vector<8x1xf32> to vector<1xf32>
      %52 = vector.shape_cast %51 : vector<1xf32> to vector<1x1xf32>
      %cst_34 = arith.constant 8.000000e+00 : f32
      %53 = vector.broadcast %cst_34 : f32 to vector<1x1xf32>
      %54 = arith.divf %52, %53 : vector<1x1xf32>
      %55 = vector.broadcast %47 : vector<1x1xf32> to vector<8x1xf32>
      %56 = arith.subf %43, %55 : vector<8x1xf32>
      %cst_35 = arith.constant 9.99999974E-6 : f32
      %57 = vector.broadcast %cst_35 : f32 to vector<1x1xf32>
      %58 = arith.addf %54, %57 : vector<1x1xf32>
      %59 = math.rsqrt %58 : vector<1x1xf32>
      %60 = vector.broadcast %59 : vector<1x1xf32> to vector<8x1xf32>
      %61 = arith.mulf %56, %60 : vector<8x1xf32>
      %c0_36 = arith.constant 0 : index
      %c0_37 = arith.constant 0 : index
      %62 = vector.load %arg6[%c0_36, %c0_37] : memref<8x1xf32, #tpu.memory_space<vmem>>, vector<8x1xf32>
      %63 = arith.mulf %61, %62 : vector<8x1xf32>
      %c0_38 = arith.constant 0 : index
      %c0_39 = arith.constant 0 : index
      %64 = vector.load %arg7[%c0_38, %c0_39] : memref<8x1xf32, #tpu.memory_space<vmem>>, vector<8x1xf32>
      %65 = arith.addf %63, %64 : vector<8x1xf32>
      %cst_40 = arith.constant 0.000000e+00 : f32
      %66 = vector.broadcast %cst_40 : f32 to vector<8x1xf32>
      %67 = arith.maximumf %65, %66 : vector<8x1xf32>
      %c0_41 = arith.constant 0 : index
      %c0_42 = arith.constant 0 : index
      %68 = vector.load %arg8[%c0_41, %c0_42] : memref<32x8xf32, #tpu.memory_space<vmem>>, vector<32x8xf32>
      %cst_43 = arith.constant dense<0.000000e+00> : vector<32x1xf32>
      %69 = tpu.matmul %68, %67, %cst_43 {dimension_numbers = #tpu.dot_dimension_numbers<[1], [0], [0], [1], [0, 0, 1, 1], [], []>} : vector<32x8xf32>, vector<8x1xf32>, vector<32x1xf32> -> vector<32x1xf32>
      %c0_44 = arith.constant 0 : index
      %c0_45 = arith.constant 0 : index
      %70 = vector.load %arg9[%c0_44, %c0_45] : memref<32x1xf32, #tpu.memory_space<vmem>>, vector<32x1xf32>
      %71 = arith.addf %69, %70 : vector<32x1xf32>
      %c0_46 = arith.constant 0 : index
      %c0_47 = arith.constant 0 : index
      %c0_48 = arith.constant 0 : index
      %72 = vector.load %arg10[%c0_46, %c0_47, %c0_48] : memref<1x32x1xf32, #tpu.memory_space<vmem>>, vector<1x32x1xf32>
      %73 = vector.shape_cast %72 : vector<1x32x1xf32> to vector<32x1xf32>
      %74 = vector.shape_cast %71 : vector<32x1xf32> to vector<1x32x1xf32>
      tpu.vector_store %arg10[%c0_46, %c0_47, %c0_48], %74 {strides = array<i32>} : memref<1x32x1xf32, #tpu.memory_space<vmem>>, vector<1x32x1xf32>,
    } else {
    }
    return
  }
  func.func @transform_0(%arg0: i32, %arg1: i32) -> (i32, i32, i32) {
    %c0_i32 = arith.constant 0 : i32
    %c0_i32_0 = arith.constant 0 : i32
    return %arg0, %c0_i32, %arg1 : i32, i32, i32
  }
  func.func @transform_1(%arg0: i32, %arg1: i32) -> (i32, i32) {
    %c0_i32 = arith.constant 0 : i32
    %c0_i32_0 = arith.constant 0 : i32
    %c0_i32_1 = arith.constant 0 : i32
    return %c0_i32, %c0_i32_0 : i32, i32
  }
  func.func @transform_2(%arg0: i32, %arg1: i32) -> (i32, i32) {
    %c0_i32 = arith.constant 0 : i32
    %c0_i32_0 = arith.constant 0 : i32
    %c0_i32_1 = arith.constant 0 : i32
    return %c0_i32, %c0_i32_0 : i32, i32
  }
  func.func @transform_3(%arg0: i32, %arg1: i32) -> (i32, i32) {
    %c0_i32 = arith.constant 0 : i32
    %c0_i32_0 = arith.constant 0 : i32
    %c0_i32_1 = arith.constant 0 : i32
    return %c0_i32, %c0_i32_0 : i32, i32
  }
  func.func @transform_4(%arg0: i32, %arg1: i32) -> (i32, i32) {
    %c0_i32 = arith.constant 0 : i32
    %c0_i32_0 = arith.constant 0 : i32
    %c0_i32_1 = arith.constant 0 : i32
    return %c0_i32, %c0_i32_0 : i32, i32
  }
  func.func @transform_5(%arg0: i32, %arg1: i32) -> (i32, i32) {
    %c0_i32 = arith.constant 0 : i32
    %c0_i32_0 = arith.constant 0 : i32
    %c0_i32_1 = arith.constant 0 : i32
    return %c0_i32, %c0_i32_0 : i32, i32
  }
  func.func @transform_6(%arg0: i32, %arg1: i32) -> (i32, i32) {
    %c0_i32 = arith.constant 0 : i32
    %c0_i32_0 = arith.constant 0 : i32
    %c0_i32_1 = arith.constant 0 : i32
    return %c0_i32, %c0_i32_0 : i32, i32
  }
  func.func @transform_7(%arg0: i32, %arg1: i32) -> (i32, i32) {
    %c0_i32 = arith.constant 0 : i32
    %c0_i32_0 = arith.constant 0 : i32
    %c0_i32_1 = arith.constant 0 : i32
    return %c0_i32, %c0_i32_0 : i32, i32
  }
  func.func @transform_8(%arg0: i32, %arg1: i32) -> (i32, i32, i32) {
    %c0_i32 = arith.constant 0 : i32
    %c0_i32_0 = arith.constant 0 : i32
    %c0_i32_1 = arith.constant 0 : i32
    return %arg0, %c0_i32, %c0_i32_0 : i32, i32, i32
  }
}

</mosaic_0001>

<bundles_post_ra>
// kernel: context_block_forward.3
= control target key start
LH: loop header
LB: loop body
LE: loop exit
PB: predicated region body
PF: predicated region fallthrough
CT: control target
= control target key end

     0   :  { %s433_s9 = smov 0   ;;  %s435_s10 = smov 0   ;;  %s469_s0 = inlined_call_operand.vmem [shape: f32[2,32,256], index: 0, kind: input, shape index: {}]   ;;  %s470_s1 = inlined_call_operand.vmem [shape: f32[2,32,1], index: 1, kind: input, shape index: {}]   ;;  %s471_s2 = inlined_call_operand.vmem [shape: f32[2,32,256], index: 2, kind: output, shape index: {}]  }
   0x1   :  { %s437_s11 = smov 0  }
   0x2 LB: > { %s24_s12 = sadd.s32 1, %s411_s10  ;;  %p354_p0 = scmp.ge.s32.totalorder %s415_s11, 1  ;;  %s415_s11 = sphi %s437_s11, %s12_s11   ;;  %s411_s10 = sphi %s435_s10, %s473_s10   ;;  %s407_s9 = sphi %s433_s9, %s472_s9  }
   0x3   : > { %p26_p1 = scmp.ge.s32.totalorder %s24_s12, 2  ;;  %p143_p2 = scmp.lt.s32.totalorder %s415_s11, 3 }
   0x5   : > { %s475_s12 = smov (%p26_p1, %s24_s12), 0  ;;  %p144_p3 = pnand %p354_p0, %p143_p2 }
   0x6   : > { %p179_p4 = scmp.lt.s32.totalorder (!%p144_p3), %s407_s9, 1  ;;  %v417_v0 = vmov (!%p144_p3), 0  }
   0x7   : > { %147 = sbr.rel (%p144_p3) target bundleno = 154 (0x9a), region = 28  ;;  %392 = vset.pattern.permute.xlu1 (!%p144_p3), %v417_v0  ;;  %391 = vset.pattern.permute.xlu0 (!%p144_p3), %v417_v0 }
   0xe   : > { %s477_s9 = smov (!%p179_p4, %s407_s9), 1 }
   0xf   : > { %s364_s13 = sshll.u32 %s477_s9, 5  ;;  %s363_s17 = sshll.u32 %s477_s9, 6 }
  0x10   : > { %s192_s16 = scalar_lea.vmem %s470_s1, %s364_s13  ;;  %s186_s20 = scalar_lea.vmem %s469_s0, %s363_s17 }
  0x11   : > { %v213_v1 = vld [vmem:[%s192_s16 + $0x10] sm:$0xff]  ;;  %v211_v2 = vld [vmem:[%s192_s16] sm:$0xff]  ;;  %v214_v3 = vld [vmem:[%s192_s16 + $0x18] sm:$0xff]  ;;  %s201_s23 = scalar_lea.vmem %s471_s2, %s363_s17 }
  0x12   : > { %227 = vperm.xlu1 %392, %v213_v1   ;;  %217 = vperm.xlu0 %391, %v211_v2   ;;  %v212_v4 = vld [vmem:[%s192_s16 + $0x8] sm:$0xff]  ;;  %v207_v5 = vld [vmem:[%s186_s20 + $0x20] sm:$0xff]  ;;  %v209_v15 = vld [vmem:[%s186_s20 + $0x30] sm:$0xff] }
  0x13   : > { %v208_v6 = vld [vmem:[%s186_s20 + $0x28] sm:$0xff]  ;;  %v203_v7 = vld [vmem:[%s186_s20] sm:$0xff]  ;;  %v210_v16 = vld [vmem:[%s186_s20 + $0x38] sm:$0xff] }
  0x14   : > { %v204_v8 = vld [vmem:[%s186_s20 + $0x8] sm:$0xff]  ;;  %v205_v17 = vld [vmem:[%s186_s20 + $0x10] sm:$0xff]  ;;  %v206_v18 = vld [vmem:[%s186_s20 + $0x18] sm:$0xff] }
  0x16   : > { %232 = vperm.xlu1 %392, %v214_v3   ;;  %222 = vperm.xlu0 %391, %v212_v4  }
  0x91   : > { %v228_v9 = vpop.permute.xlu1 %227  ;;  %v218_v10 = vpop.permute.xlu0 %217 }
  0x92   : > { %v239_v11 = vadd.f32 %v228_v9, %v207_v5  ;;  %v240_v12 = vadd.f32 %v228_v9, %v208_v6  ;;  %v235_v13 = vadd.f32 %v218_v10, %v203_v7  ;;  %v236_v14 = vadd.f32 %v218_v10, %v204_v8 }
  0x94   : > { %247 = vst [vmem:[%s201_s23 + $0x20] sm:$0xff] %v239_v11  ;;  %248 = vst [vmem:[%s201_s23 + $0x28] sm:$0xff] %v240_v12 }
  0x95   : > { %243 = vst [vmem:[%s201_s23] sm:$0xff] %v235_v13  ;;  %244 = vst [vmem:[%s201_s23 + $0x8] sm:$0xff] %v236_v14  ;;  %v233_v19 = vpop.permute.xlu1 %232  ;;  %v223_v20 = vpop.permute.xlu0 %222 }
  0x96   : > { %v241_v21 = vadd.f32 %v233_v19, %v209_v15  ;;  %v242_v22 = vadd.f32 %v233_v19, %v210_v16  ;;  %v237_v23 = vadd.f32 %v223_v20, %v205_v17  ;;  %v238_v24 = vadd.f32 %v223_v20, %v206_v18 }
  0x98   : > { %249 = vst [vmem:[%s201_s23 + $0x30] sm:$0xff] %v241_v21  ;;  %250 = vst [vmem:[%s201_s23 + $0x38] sm:$0xff] %v242_v22 }
  0x99   : > { %245 = vst [vmem:[%s201_s23 + $0x10] sm:$0xff] %v237_v23  ;;  %246 = vst [vmem:[%s201_s23 + $0x18] sm:$0xff] %v238_v24 }
  0x9a PF: > { %s12_s11 = sadd.s32 1, %s415_s11   ;;  %s472_s9 = smov %s411_s10 }
  0x9b   : > { %p9_p5 = scmp.ge.s32.totalorder %s12_s11, 4   ;;  %s473_s10 = smov %s475_s12 }
  0x9d   :  { %11 = sbr.rel (!%p9_p5) target bundleno = 2 (0x2), region = 61 }

// kernel: context_block_forward.2
= control target key start
LH: loop header
LB: loop body
LE: loop exit
PB: predicated region body
PF: predicated region fallthrough
CT: control target
= control target key end

     0   :  { %s996_s27 = smov 0   ;;  %s998_s28 = smov 0   ;;  %s1126_s0 = inlined_call_operand.vmem [shape: f32[2,32,256], index: 0, kind: input, shape index: {}]   ;;  %s1127_s1 = inlined_call_operand.vmem [shape: f32[1,32], index: 1, kind: input, shape index: {}]   ;;  %s1128_s2 = inlined_call_operand.vmem [shape: f32[8,32], index: 2, kind: input, shape index: {}]   ;;  %s1129_s3 = inlined_call_operand.vmem [shape: f32[8,1], index: 3, kind: input, shape index: {}]   ;;  %s1130_s4 = inlined_call_operand.vmem [shape: f32[8,1], index: 4, kind: input, shape index: {}]   ;;  %s1131_s5 = inlined_call_operand.vmem [shape: f32[8,1], index: 5, kind: input, shape index: {}]   ;;  %s1132_s6 = inlined_call_operand.vmem [shape: f32[32,8], index: 6, kind: input, shape index: {}]   ;;  %s1133_s7 = inlined_call_operand.vmem [shape: f32[32,1], index: 7, kind: input, shape index: {}]   ;;  %s1134_s8 = inlined_call_operand.vmem [shape: f32[2,32,1], index: 8, kind: output, shape index: {}]  }
   0x1   :  { %s1000_s29 = smov 0  }
   0x2 LB: > { %s30_s30 = sadd.s32 1, %s940_s28  ;;  %p822_p0 = scmp.ge.s32.totalorder %s944_s29, 1  ;;  %s944_s29 = sphi %s1000_s29, %s18_s29   ;;  %s940_s28 = sphi %s998_s28, %s1136_s28   ;;  %s936_s27 = sphi %s996_s27, %s1135_s27  }
   0x3   : > { %p32_p1 = scmp.ge.s32.totalorder %s30_s30, 2  ;;  %p281_p2 = scmp.lt.s32.totalorder %s944_s29, 3 }
   0x5   : > { %s1138_s30 = smov (%p32_p1, %s30_s30), 0  ;;  %p282_p3 = pnand %p822_p0, %p281_p2 }
   0x6   : > { %p320_p4 = scmp.lt.s32.totalorder (!%p282_p3), %s936_s27, 1  ;;  %v946_v0 = vmov (!%p282_p3), 0.0   ;;  %v354_v13 = vld [vmem:[%s1127_s1] sm:$0x1] (!%p282_p3)  ;;  %vm355_vm0 = vcmask (!%p282_p3), 261120   ;;  %vm338_vm1 = vcmask (!%p282_p3), 0   ;;  %v446_v25 = vlaneseq (!%p282_p3) }
   0x7   : > { %285 = sbr.rel (%p282_p3) target bundleno = 1200 (0x4b0), region = 52  ;;  %423 = vmatprep.mubr.f32.mxu0 (!%p282_p3), %v946_v0  ;;  %v947_v14 = vmov (!%p282_p3), -1e+30   ;;  %340 = vst.msk [vmem:[#allocation3] sm:$0x1] (!%p282_p3), %vm338_vm1, %v946_v0  ;;  %vm431_vm2 = vcmask (!%p282_p3), 1040384  }
   0x8   : > { %339 = vst.msk [vmem:[#allocation2] sm:$0x1] (!%p282_p3), %vm338_vm1, %v947_v14  ;;  %v948_v20 = vmov (!%p282_p3), 0   ;;  %vm341_vm3 = vcmask (!%p282_p3), 7168   ;;  %v447_v26 = vshrl.u32 (!%p282_p3), %v446_v25, 7  ;;  %v949_v53 = vmov (!%p282_p3), 0.0|0.0  }
   0x9   : > { %911 = vset.pattern.permute.xlu0 (!%p282_p3), %v948_v20  ;;  %342 = vst.msk [vmem:[#allocation4] sm:$0xff] (!%p282_p3), %vm341_vm3, %v946_v0  ;;  %343 = vst.msk [vmem:[#allocation4 + $0x8] sm:$0xff] (!%p282_p3), %vm341_vm3, %v946_v0  ;;  %874 = vmatprep.subr.bf16.mxu1 (!%p282_p3), %v949_v53  ;;  %vm950_vm4 = vmmov (!%p282_p3), 0   ;;  %vm647_vm5 = vcmask (!%p282_p3), 64512  }
   0xa   : > { %344 = vst.msk [vmem:[#allocation4 + $0x10] sm:$0xff] (!%p282_p3), %vm341_vm3, %v946_v0  ;;  %345 = vst.msk [vmem:[#allocation4 + $0x18] sm:$0xff] (!%p282_p3), %vm341_vm3, %v946_v0  ;;  %v1048_v27 = vsub.s32 (!%p282_p3), 0, %v447_v26  ;;  %855 = vmatprep.mubr.msk.f32.mxu1 (!%p282_p3), %vm950_vm4, %v946_v0  ;;  %v537_v26 = vld [vmem:[%s1128_s2] sm:$0xff] (!%p282_p3) }
   0xe   : > { %s1140_s27 = smov (!%p320_p4, %s936_s27), 1  ;;  %v456_v56 = vld [vmem:[#allocation3] sm:$0x1] }
   0xf   : > { %s835_s9 = sshll.u32 %s1140_s27, 6  ;;  %v430_v21 = vld [vmem:[#allocation2] sm:$0x1]  ;;  %s836_s13 = sshll.u32 %s1140_s27, 5 }
  0x10   : > { %s327_s12 = scalar_lea.vmem %s1126_s0, %s835_s9  ;;  %v466_v60 = vld [vmem:[#allocation4] sm:$0xff]  ;;  %s333_s27 = scalar_lea.vmem %s1134_s8, %s836_s13 }
  0x11   : > { %v1021_v1 = vld [vmem:[%s327_s12 + $0x8] sm:$0xff]  ;;  %v1023_v2 = vld [vmem:[%s327_s12 + $0x18] sm:$0xff]  ;;  %v346_v3 = vld [vmem:[%s327_s12] sm:$0xff] }
  0x12   : > { %v866_v4 = vpack.c.bf16 %v1023_v2, %v1021_v1  ;;  %v348_v5 = vld [vmem:[%s327_s12 + $0x10] sm:$0xff]  ;;  %v351_v6 = vld [vmem:[%s327_s12 + $0x28] sm:$0xff]  ;;  %v1027_v7 = vld [vmem:[%s327_s12 + $0x38] sm:$0xff] }
  0x13   : > { %v868_v8 = vpack.c.bf16 %v348_v5, %v346_v3  ;;  %v870_v9 = vpack.c.bf16 %v1027_v7, %v351_v6  ;;  %v350_v10 = vld [vmem:[%s327_s12 + $0x20] sm:$0xff]  ;;  %v352_v11 = vld [vmem:[%s327_s12 + $0x30] sm:$0xff] }
  0x14   : > { %867 = vmatprep.subr.bf16.mxu0 %v866_v4  ;;  %v872_v12 = vpack.c.bf16 %v352_v11, %v350_v10  ;;  %v468_v4 = vld [vmem:[#allocation4 + $0x10] sm:$0xff] }
  0x15   : > { %869 = vmatpush1.bf16.msra.mxu0 %v868_v8 }
  0x16   : > { %871 = vmatprep.subr.bf16.mxu0 %v870_v9  ;;  %v469_v9 = vld [vmem:[#allocation4 + $0x18] sm:$0xff] }
  0x19   : > { %873 = vmatpush1.bf16.msra.mxu0 %v872_v12 }
  0x1c   : > { %827 = vmatmul.mubr.msk.f32.vlgmr.msra.gmra.mrb[0].mxu0 %vm355_vm0, %v354_v13 }
  0xef   : > { %v425_v15 = vpop.f32.mrb[0].mxu0 }
  0xf0   : > { %v427_v16 = vpop.f32.mrb[1].mxu0  ;;  %v432_v17 = vsel %vm431_vm2, %v425_v15, -inf }
  0xf1   : > { %v433_v18 = vsel %vm431_vm2, %v427_v16, -inf }
  0xf2   : > { %v434_v19 = vmax.f32 %v432_v17, %v433_v18 }
  0xf4   : > { %435 = vmax.xlane.f32.xlu0 %v434_v19 }
 0x181   : > { %v436_v22 = vpop.xlane.xlu0 %435 }
 0x182   : > { %v437_v23 = vmax.f32 %v430_v21, %v436_v22 }
 0x184   : > { %v438_v24 = vsub.f32 %v430_v21, %v437_v23  ;;  %517 = vst.msk [vmem:[#allocation2] sm:$0x1] %vm338_vm1, %v437_v23  ;;  %443 = vperm.xlu0 %911, %v437_v23  }
 0x186   : > { %v439_v54 = vmul.f32 1.442695, %v438_v24 }
 0x203   : > { %v444_v28 = vpop.permute.xlu0 %443 }
 0x204   : > { %v449_v29 = vrot.slane %v444_v28, %v1048_v27  ;;  %v641_v28 = vld [vmem:[%s1132_s6 + $0x10] sm:$0xff] }
 0x206   : > { %v450_v30 = vsub.f32 %v425_v15, %v449_v29  ;;  %v451_v31 = vsub.f32 %v427_v16, %v449_v29  ;;  %v538_v29 = vld [vmem:[%s1129_s3] sm:$0xff] }
 0x208   : > { %v452_v32 = vmul.f32 1.442695, %v450_v30  ;;  %v454_v33 = vmul.f32 1.442695, %v451_v31 }
 0x20a   : > { %912 = vpow2.f32 %v452_v32 }
 0x20b   : > { %914 = vpow2.f32 %v454_v33 }
 0x20c   : > { %916 = vpow2.f32 %v439_v54 }
 0x214   : > { %v913_v34 = vpop.eup %912 }
 0x215   : > { %v915_v35 = vpop.eup %914  ;;  %v458_v36 = vsel %vm431_vm2, %v913_v34, 0.0  ;;  %v483_v37 = vrot.slane %v913_v34, %v1048_v27 }
 0x216   : > { %v459_v38 = vsel %vm431_vm2, %v915_v35, 0.0  ;;  %v487_v39 = vrot.slane %v915_v35, %v1048_v27  ;;  %v917_v55 = vpop.eup %916 }
 0x217   : > { %v460_v40 = vadd.f32 %v459_v38, %v458_v36  ;;  %v488_v41 = vmul.f32 %v483_v37, %v346_v3  ;;  %v490_v42 = vmul.f32 %v483_v37, %v348_v5  ;;  %v492_v43 = vmul.f32 %v483_v37, %v350_v10 }
 0x218   : > { %v489_v44 = vmul.f32 %v487_v39, %v1021_v1  ;;  %v491_v45 = vmul.f32 %v487_v39, %v1023_v2  ;;  %v493_v46 = vmul.f32 %v487_v39, %v351_v6  ;;  %v494_v47 = vmul.f32 %v483_v37, %v352_v11  ;;  %v467_v1 = vld [vmem:[#allocation4 + $0x8] sm:$0xff] }
 0x219   : > { %461 = vadd.xlane.f32.xlu1 %v460_v40  ;;  %v495_v48 = vmul.f32 %v487_v39, %v1027_v7  ;;  %v457_v57 = vmul.f32 %v917_v55, %v456_v56  ;;  %v474_v58 = vrot.slane %v917_v55, %v1048_v27  ;;  %v636_v55 = vld [vmem:[%s1131_s5] sm:$0xff] }
 0x21a   : > { %v496_v49 = vadd.f32 %v489_v44, %v488_v41  ;;  %v499_v50 = vadd.f32 %v491_v45, %v490_v42  ;;  %v502_v51 = vadd.f32 %v493_v46, %v492_v43 }
 0x21b   : > { %v505_v52 = vadd.f32 %v495_v48, %v494_v47  ;;  %v476_v62 = vmul.f32 %v474_v58, %v466_v60  ;;  %v477_v3 = vmul.f32 %v474_v58, %v467_v1  ;;  %v478_v7 = vmul.f32 %v474_v58, %v468_v4  ;;  %v642_v60 = vld [vmem:[%s1132_s6 + $0x18] sm:$0xff]  ;;  %v645_v1 = vld [vmem:[%s1133_s7 + $0x10] sm:$0xff] }
 0x21c   : > { %v479_v11 = vmul.f32 %v474_v58, %v469_v9 }
 0x21d   : > { %497 = vadd.xlane.f32.xlu1 %v496_v49 }
 0x221   : > { %500 = vadd.xlane.f32.xlu1 %v499_v50 }
 0x225   : > { %503 = vadd.xlane.f32.xlu1 %v502_v51 }
 0x229   : > { %506 = vadd.xlane.f32.xlu1 %v505_v52 }
 0x2a6   : > { %v462_v59 = vpop.xlane.xlu1 %461 }
 0x2a7   : > { %v463_v61 = vadd.f32 %v462_v59, %v457_v57  ;;  %v640_v59 = vld [vmem:[%s1132_s6 + $0x8] sm:$0xff] }
 0x2a9   : > { %465 = vst.msk [vmem:[#allocation3] sm:$0x1] %vm338_vm1, %v463_v61  ;;  %v644_v61 = vld [vmem:[%s1133_s7 + $0x8] sm:$0xff] }
 0x2aa   : > { %v498_v63 = vpop.xlane.xlu1 %497 }
 0x2ab   : > { %v508_v2 = vadd.f32 %v498_v63, %v476_v62  ;;  %v646_v62 = vld [vmem:[%s1133_s7 + $0x18] sm:$0xff]  ;;  %v643_v63 = vld [vmem:[%s1133_s7] sm:$0xff] }
 0x2ad   : > { %513 = vst.msk [vmem:[#allocation4] sm:$0xff] %vm341_vm3, %v508_v2 }
 0x2ae   : > { %v501_v0 = vpop.xlane.xlu1 %500 }
 0x2af   : > { %v509_v5 = vadd.f32 %v501_v0, %v477_v3 }
 0x2b0   : > { %v525_v6 = vld [vmem:[#allocation3] sm:$0x1] }
 0x2b1   : > { %514 = vst.msk [vmem:[#allocation4 + $0x8] sm:$0xff] %vm341_vm3, %v509_v5  ;;  %918 = vrcp.f32 %v525_v6 }
 0x2b2   : > { %v504_v8 = vpop.xlane.xlu1 %503 }
 0x2b3   : > { %v510_v10 = vadd.f32 %v504_v8, %v478_v7 }
 0x2b4   : > { %v521_v16 = vld [vmem:[#allocation4] sm:$0xff] }
 0x2b5   : > { %515 = vst.msk [vmem:[#allocation4 + $0x10] sm:$0xff] %vm341_vm3, %v510_v10 }
 0x2b6   : > { %v507_v12 = vpop.xlane.xlu1 %506 }
 0x2b7   : > { %v511_v13 = vadd.f32 %v507_v12, %v479_v11 }
 0x2b8   : > { %v522_v17 = vld [vmem:[#allocation4 + $0x8] sm:$0xff] }
 0x2b9   : > { %516 = vst.msk [vmem:[#allocation4 + $0x18] sm:$0xff] %vm341_vm3, %v511_v13 }
 0x2bb   : > { %v919_v14 = vpop.eup %918 }
 0x2bc   : > { %v531_v15 = vrot.slane %v919_v14, %v1048_v27  ;;  %v523_v20 = vld [vmem:[#allocation4 + $0x10] sm:$0xff]  ;;  %v639_v27 = vld [vmem:[%s1132_s6] sm:$0xff] }
 0x2bd   : > { %860 = vmatprep.mubr.msk.f32.mxu0 %vm647_vm5, %v639_v27 }
 0x2be   : > { %v533_v18 = vmul.f32 %v531_v15, %v521_v16  ;;  %v534_v19 = vmul.f32 %v531_v15, %v522_v17  ;;  %v535_v23 = vmul.f32 %v531_v15, %v523_v20 }
 0x2c0   : > { %v875_v21 = vpack.c.bf16 %v534_v19, %v533_v18  ;;  %v524_v22 = vld [vmem:[#allocation4 + $0x18] sm:$0xff] }
 0x2c1   : > { %v536_v24 = vmul.f32 %v531_v15, %v524_v22 }
 0x2c2   : > { %876 = vmatpush3.bf16.msra.mxu1 %v875_v21 }
 0x2c3   : > { %877 = vmatprep.subr.bf16.mxu1 %v949_v53  ;;  %v878_v25 = vpack.c.bf16 %v536_v24, %v535_v23  ;;  %v634_v53 = vld [vmem:[%s1130_s4] sm:$0xff] }
 0x2c6   : > { %879 = vmatpush3.bf16.msra.mxu1 %v878_v25 }
 0x2c9   : > { %856 = vmatmul.mubr.msk.f32.vlgmr.msra.gmra.mrb[0].mxu1 %vm355_vm0, %v537_v26 }
 0x2ca   : > { %863 = vmatprep.mubr.msk.f32.mxu1 %vm647_vm5, %v641_v28 }
 0x39c   : > { %v608_v30 = vpop.f32.mrb[0].mxu1 }
 0x39d   : > { %v609_v31 = vadd.f32 %v608_v30, %v538_v29  ;;  %v857_v32 = vpop.f32.mrb[1].mxu1 }
 0x39f   : > { %v612_v33 = vsel %vm341_vm3, %v609_v31, 0.0 }
 0x3a0   : > { %v613_v34 = vrot.slane %v612_v33, 4 }
 0x3a2   : > { %v614_v35 = vadd.f32 %v613_v34, %v612_v33 }
 0x3a4   : > { %v615_v36 = vrot.slane %v614_v35, 2 }
 0x3a6   : > { %v616_v37 = vadd.f32 %v615_v36, %v614_v35 }
 0x3a8   : > { %v617_v38 = vrot.slane %v616_v37, 1 }
 0x3aa   : > { %v618_v39 = vadd.f32 %v617_v38, %v616_v37 }
 0x3ac   : > { %v620_v40 = vmul.f32 0.125, %v618_v39 }
 0x3ae   : > { %v621_v41 = vsub.f32 %v609_v31, %v620_v40 }
 0x3b0   : > { %v622_v42 = vmul.f32 %v621_v41, %v621_v41 }
 0x3b2   : > { %v623_v43 = vsel %vm341_vm3, %v622_v42, 0.0 }
 0x3b3   : > { %v624_v44 = vrot.slane %v623_v43, 4 }
 0x3b5   : > { %v625_v45 = vadd.f32 %v624_v44, %v623_v43 }
 0x3b7   : > { %v626_v46 = vrot.slane %v625_v45, 2 }
 0x3b9   : > { %v627_v47 = vadd.f32 %v626_v46, %v625_v45 }
 0x3bb   : > { %v628_v48 = vrot.slane %v627_v47, 1 }
 0x3bd   : > { %v629_v49 = vadd.f32 %v628_v48, %v627_v47 }
 0x3bf   : > { %v630_v50 = vmul.f32 0.125, %v629_v49 }
 0x3c1   : > { %v631_v51 = vadd.f32 1e-05, %v630_v50 }
 0x3c3   : > { %920 = vrsqrt.f32 %v631_v51 }
 0x3cd   : > { %v921_v52 = vpop.eup %920 }
 0x3ce   : > { %v633_v54 = vmul.f32 %v921_v52, %v621_v41 }
 0x3d0   : > { %v635_v56 = vmul.f32 %v634_v53, %v633_v54 }
 0x3d2   : > { %v637_v57 = vadd.f32 %v636_v55, %v635_v56 }
 0x3d4   : > { %v638_v58 = vmax.f32 %v637_v57, 0.0 }
 0x3d6   : > { %858 = vmatprep.subr.mxu0 %v638_v58  ;;  %880 = vmatprep.subr.mxu1 %v638_v58 }
 0x3d7   : > { %859 = vmatpush3.msra.mxu0 %v638_v58  ;;  %881 = vmatpush3.msra.mxu1 %v638_v58 }
 0x3d8   : > { %861 = vmatmul.mubr.msk.f32.vlgmr.msra.gmra.mrb[2].mxu0 %vm647_vm5, %v640_v59  ;;  %864 = vmatmul.mubr.msk.f32.vlgmr.msra.gmra.mrb[2].mxu1 %vm647_vm5, %v642_v60 }
 0x4ab   : > { %v862_v2 = vpop.f32.mrb[2].mxu0  ;;  %v865_v3 = vpop.f32.mrb[2].mxu1 }
 0x4ac   : > { %v732_v0 = vadd.f32 %v862_v2, %v644_v61  ;;  %v742_v4 = vadd.f32 %v865_v3, %v646_v62  ;;  %v726_v5 = vpop.f32.mrb[3].mxu0  ;;  %v736_v6 = vpop.f32.mrb[3].mxu1 }
 0x4ad   : > { %v727_v7 = vadd.f32 %v726_v5, %v643_v63  ;;  %v737_v8 = vadd.f32 %v736_v6, %v645_v1 }
 0x4ae   : > { %746 = vst.msk [vmem:[%s333_s27 + $0x8] sm:$0xff] %vm341_vm3, %v732_v0  ;;  %748 = vst.msk [vmem:[%s333_s27 + $0x18] sm:$0xff] %vm341_vm3, %v742_v4 }
 0x4af   : > { %745 = vst.msk [vmem:[%s333_s27] sm:$0xff] %vm341_vm3, %v727_v7  ;;  %747 = vst.msk [vmem:[%s333_s27 + $0x10] sm:$0xff] %vm341_vm3, %v737_v8 }
 0x4b0 PF: > { %s18_s29 = sadd.s32 1, %s944_s29   ;;  %s1135_s27 = smov %s940_s28 }
 0x4b1   : > { %p15_p5 = scmp.ge.s32.totalorder %s18_s29, 4   ;;  %s1136_s28 = smov %s1138_s30 }
 0x4b3   :  { %17 = sbr.rel (!%p15_p5) target bundleno = 2 (0x2), region = 90 }

</bundles_post_ra>
